<compile_context>
chip_gen: v6e
topology: v6e:2x2x1
jax: 0.10.0
libtpu: 0.0.40
codegen_flags: <defaults>
</compile_context>

<pallas_src>
import jax
import jax.numpy as jnp
import numpy as np
from jax.experimental import pallas as pl
from jax.experimental.pallas import tpu as pltpu


def _cdiv(a, b):
    return (a + b - 1) // b


def _make_kernel(with_cls, tc):
    """Embed one (tr, tc) tile of tokens into a (tr, tc, H) output block."""

    def kernel(x_ref, w_ref, b_ref, m_ref, *rest):
        if with_cls:
            c_ref, o_ref = rest
        else:
            (o_ref,) = rest
        x = x_ref[...]                               # (tr, tc, 1) f32, NaN == mask token
        nan = jnp.isnan(x)                           # (tr, tc, 1)
        emb = x * w_ref[...] + b_ref[...]            # VPU broadcast -> (tr, tc, H) f32
        out = jnp.where(nan, m_ref[...], emb)        # mask tokens -> mask embedding
        if with_cls:
            # token-axis position 0 of every row is the CLS slot
            col = jax.lax.broadcasted_iota(jnp.int32, x.shape, 1)
            col = col + pl.program_id(1) * tc
            out = jnp.where(col == 0, c_ref[...], out)
        o_ref[...] = out.astype(o_ref.dtype)

    return kernel


def _vmem_limit_bytes():
    try:
        cap = pltpu.get_tpu_info().vmem_capacity_bytes
    except Exception:
        cap = 128 * 1024 * 1024
    # Leave headroom for Mosaic scratch / pipelining:
    # 48 MiB on v7x (64 MiB physical), 64 MiB on v5e/v6e (128 MiB physical).
    return min(64 * 1024 * 1024, (cap * 3) // 4)


def _choose_tiles(rk, ck, h, out_itemsize, block_budget_bytes):
    """Pick (tr, tc) so double-buffered x + out blocks fit the VMEM byte budget."""
    # per-token VMEM: one output row (h * itemsize) + one lane-padded f32 x slot (512 B)
    bytes_per_token = h * out_itemsize + 512
    tok = max(8, block_budget_bytes // (2 * bytes_per_token))
    total = rk * ck
    # keep >= 2 grid steps when there is enough work (v7x megacore sharding)
    if total >= 4096:
        tok = min(tok, max(2048, _cdiv(total, 2)))
    if tok >= ck:
        tc = ck                                        # full token axis: always a legal block dim
        tr = max(1, min(rk, tok // max(ck, 1)))
    else:
        tr = 1
        tc = min(ck, max(128, (tok // 128) * 128))     # 128-aligned: legal for f32/bf16/int8
    return tr, tc


def continuous_embedding_forward(
    x,
    weight,
    bias,
    mask_embedding,
    *,
    cls_token=None,
    cls_axis=-2,
    block_budget_bytes=None,
):
    """ContinuousEmbedding.forward.  x: (B, *, L) float, NaN == masking token.

    Returns (B, *, L, H), or (B, *, L+1, H) when cls_token is given and cls_axis
    is the token axis (-2 of the embedded output, the module default).
    """
    weight = jnp.reshape(weight, (-1,))               # accept (H,) or (H, 1)
    H = weight.shape[0]
    out_dtype = weight.dtype
    itemsize = jnp.dtype(out_dtype).itemsize

    out_ndim = x.ndim + 1
    fuse_cls = cls_token is not None and (cls_axis % out_ndim) == out_ndim - 2
    # TODO(synk): cls_axis other than the token axis falls back to a post-kernel
    #             concatenate (extra HBM pass); not fused here.
    concat_cls = cls_token is not None and not fuse_cls

    if fuse_cls:
        lead = x.shape[:-1]
        rk = int(np.prod(lead)) if lead else 1
        L = x.shape[-1]
        ck = L + 1
        x2 = jnp.reshape(x, (rk, L)).astype(jnp.float32)
        x2 = jnp.pad(x2, ((0, 0), (1, 0)))             # CLS slot (value irrelevant, kernel overwrites)
        out_shape_final = (*lead, ck, H)
    else:
        rk = 1
        ck = int(np.prod(x.shape))
        x2 = jnp.reshape(x, (rk, ck)).astype(jnp.float32)
        out_shape_final = (*x.shape, H)

    x3 = x2[..., None]                                 # (rk, ck, 1)

    vmem_limit = _vmem_limit_bytes()
    if block_budget_bytes is None:
        block_budget_bytes = min(24 * 1024 * 1024, (vmem_limit * 2) // 5)

    tr, tc = _choose_tiles(rk, ck, H, itemsize, block_budget_bytes)
    grid = (_cdiv(rk, tr), _cdiv(ck, tc))

    def _row(v):
        return jnp.reshape(v, (1, 1, H))

    rows = [_row(weight), _row(bias), _row(mask_embedding)]
    if fuse_cls:
        rows.append(_row(jnp.reshape(cls_token, (-1,)).astype(out_dtype)))

    row_spec = pl.BlockSpec((1, 1, H), lambda r, c: (0, 0, 0))
    in_specs = [pl.BlockSpec((tr, tc, 1), lambda r, c: (r, c, 0))]
    in_specs += [row_spec] * len(rows)

    n_tok = rk * ck
    cost = pl.CostEstimate(
        flops=2 * n_tok * H,
        transcendentals=0,
        bytes_accessed=n_tok * 4 + n_tok * H * itemsize + len(rows) * H * itemsize,
    )

    out = pl.pallas_call(
        _make_kernel(fuse_cls, tc),
        out_shape=jax.ShapeDtypeStruct((rk, ck, H), out_dtype),
        grid=grid,
        in_specs=in_specs,
        out_specs=pl.BlockSpec((tr, tc, H), lambda r, c: (r, c, 0)),
        compiler_params=pltpu.CompilerParams(
            dimension_semantics=("parallel", "parallel"),
            vmem_limit_bytes=vmem_limit,
        ),
        cost_estimate=cost,
    )(x3, *rows)

    out = jnp.reshape(out, out_shape_final)            # contiguous reshape -> free

    if concat_cls:
        shp = list(out.shape)
        shp[cls_axis] = 1
        cls_block = jnp.broadcast_to(
            jnp.reshape(cls_token, (H,)).astype(out.dtype), shp
        )
        out = jnp.concatenate([cls_block, out], axis=cls_axis)
    return out


def _reference_forward(x, weight, bias, mask_embedding, cls_token=None, cls_axis=-2):
    """Pure-JAX reference mirroring the PyTorch module (depth=1, norm=False)."""
    weight = jnp.reshape(weight, (-1,))
    H = weight.shape[0]
    nan = jnp.isnan(x)
    xv = jnp.where(nan, 0.0, x).astype(jnp.float32)
    out = xv[..., None] * weight.astype(jnp.float32) + bias.astype(jnp.float32)
    out = out.astype(weight.dtype)
    out = jnp.where(nan[..., None], mask_embedding.astype(out.dtype), out)
    if cls_token is not None:
        shp = list(out.shape)
        shp[cls_axis] = 1
        cls_block = jnp.broadcast_to(jnp.reshape(cls_token, (H,)).astype(out.dtype), shp)
        out = jnp.concatenate([cls_block, out], axis=cls_axis)
    return out


if __name__ == "__main__":
    key = jax.random.PRNGKey(0)
    k_x, k_w, k_b, k_m, k_c, k_x2 = jax.random.split(key, 6)

    B, L, H = 2, 16, 32

    # nn.Linear(1, H) params, mask embedding, and a CLS token
    weight = jax.random.normal(k_w, (H, 1), dtype=jnp.float32)
    bias = jax.random.uniform(k_b, (H,), dtype=jnp.float32, minval=-1.0, maxval=1.0)
    mask_embedding = jax.random.uniform(k_m, (H,), dtype=jnp.float32, minval=-1.0, maxval=1.0)
    cls_token = jax.random.uniform(k_c, (H,), dtype=jnp.float32, minval=-1.0, maxval=1.0)

    x = jax.random.normal(k_x, (B, L), dtype=jnp.float32) * 1.5
    x = x.at[0, 3].set(jnp.nan)
    x = x.at[1, 10].set(jnp.nan)

    # 1) default path (no CLS)
    out = jax.block_until_ready(continuous_embedding_forward(x, weight, bias, mask_embedding))
    ref = _reference_forward(x, weight, bias, mask_embedding)
    assert out.shape == (B, L, H), out.shape
    np.testing.assert_allclose(np.asarray(out), np.asarray(ref), rtol=1e-6, atol=1e-6)

    # 2) fused CLS path (cls_axis=-2, the module default)
    out_cls = jax.block_until_ready(
        continuous_embedding_forward(
            x, weight, bias, mask_embedding, cls_token=cls_token, cls_axis=-2))
    ref_cls = _reference_forward(
        x, weight, bias, mask_embedding, cls_token=cls_token, cls_axis=-2)
    assert out_cls.shape == (B, L + 1, H), out_cls.shape
    np.testing.assert_allclose(np.asarray(out_cls), np.asarray(ref_cls), rtol=1e-6, atol=1e-6)

    # 3) larger shape exercising a multi-step grid and partial edge blocks
    xb = jax.random.normal(k_x2, (8, 1000), dtype=jnp.float32)
    xb = jnp.where(jax.random.uniform(k_x2, (8, 1000)) < 0.05, jnp.nan, xb)
    out_b = jax.block_until_ready(continuous_embedding_forward(xb, weight, bias, mask_embedding))
    ref_b = _reference_forward(xb, weight, bias, mask_embedding)
    np.testing.assert_allclose(np.asarray(out_b), np.asarray(ref_b), rtol=1e-6, atol=1e-6)

    out_bc = jax.block_until_ready(
        continuous_embedding_forward(xb, weight, bias, mask_embedding, cls_token=cls_token))
    ref_bc = _reference_forward(xb, weight, bias, mask_embedding, cls_token=cls_token)
    np.testing.assert_allclose(np.asarray(out_bc), np.asarray(ref_bc), rtol=1e-6, atol=1e-6)

    # 4) bf16 embedding table (exercises the dtype-aware tiling / cast-on-store)
    w16 = weight.astype(jnp.bfloat16)
    b16 = bias.astype(jnp.bfloat16)
    m16 = mask_embedding.astype(jnp.bfloat16)
    out16 = jax.block_until_ready(continuous_embedding_forward(x, w16, b16, m16))
    ref16 = _reference_forward(x, w16, b16, m16)
    assert out16.dtype == jnp.bfloat16, out16.dtype
    np.testing.assert_allclose(
        np.asarray(out16, dtype=np.float32),
        np.asarray(ref16, dtype=np.float32),
        rtol=2e-2, atol=2e-2,
    )

    print("KERNEL_OK")
</pallas_src>

<mosaic_0001>
module attributes {stable_mosaic.version = 11 : i64} {
  func.func @kernel(%arg0: i32, %arg1: i32, %arg2: memref<1x32x1xf32, #tpu.memory_space<vmem>>, %arg3: memref<1x1x32xf32, #tpu.memory_space<vmem>>, %arg4: memref<1x1x32xf32, #tpu.memory_space<vmem>>, %arg5: memref<1x1x32xf32, #tpu.memory_space<vmem>>, %arg6: memref<1x32x32xf32, #tpu.memory_space<vmem>>) attributes {dimension_semantics = [#tpu.dimension_semantics<parallel>, #tpu.dimension_semantics<parallel>], iteration_bounds = array<i64: 1, 1>, scalar_prefetch = 0 : i64, scratch_operands = 0 : i64, tpu.core_type = #tpu.core_type<tc>, window_params = [{transform_indices = @transform_0, window_bounds = array<i64: 1, 32, 1>}, {pipeline_mode = #tpu.pipeline_mode<synchronous>, transform_indices = @transform_1, window_bounds = array<i64: 1, 1, 32>}, {pipeline_mode = #tpu.pipeline_mode<synchronous>, transform_indices = @transform_2, window_bounds = array<i64: 1, 1, 32>}, {pipeline_mode = #tpu.pipeline_mode<synchronous>, transform_indices = @transform_3, window_bounds = array<i64: 1, 1, 32>}, {transform_indices = @transform_4, window_bounds = array<i64: 1, 32, 32>}]} {
    %c0 = arith.constant 0 : index
    %c0_0 = arith.constant 0 : index
    %c0_1 = arith.constant 0 : index
    %0 = vector.load %arg2[%c0, %c0_0, %c0_1] : memref<1x32x1xf32, #tpu.memory_space<vmem>>, vector<1x32x1xf32>
    %1 = arith.cmpf one, %0, %0 : vector<1x32x1xf32>
    %c0_2 = arith.constant 0 : index
    %c0_3 = arith.constant 0 : index
    %c0_4 = arith.constant 0 : index
    %2 = vector.load %arg3[%c0_2, %c0_3, %c0_4] : memref<1x1x32xf32, #tpu.memory_space<vmem>>, vector<1x1x32xf32>
    %3 = vector.broadcast %0 : vector<1x32x1xf32> to vector<1x32x32xf32>
    %4 = vector.broadcast %2 : vector<1x1x32xf32> to vector<1x32x32xf32>
    %5 = arith.mulf %3, %4 : vector<1x32x32xf32>
    %c0_5 = arith.constant 0 : index
    %c0_6 = arith.constant 0 : index
    %c0_7 = arith.constant 0 : index
    %6 = vector.load %arg4[%c0_5, %c0_6, %c0_7] : memref<1x1x32xf32, #tpu.memory_space<vmem>>, vector<1x1x32xf32>
    %7 = vector.broadcast %6 : vector<1x1x32xf32> to vector<1x32x32xf32>
    %8 = arith.addf %5, %7 : vector<1x32x32xf32>
    %c0_8 = arith.constant 0 : index
    %c0_9 = arith.constant 0 : index
    %c0_10 = arith.constant 0 : index
    %9 = vector.load %arg5[%c0_8, %c0_9, %c0_10] : memref<1x1x32xf32, #tpu.memory_space<vmem>>, vector<1x1x32xf32>
    %10 = vector.shape_cast %1 : vector<1x32x1xi1> to vector<1x32x1xi1>
    %11 = vector.broadcast %10 : vector<1x32x1xi1> to vector<1x32x32xi1>
    %12 = vector.shape_cast %9 : vector<1x1x32xf32> to vector<1x1x32xf32>
    %13 = vector.broadcast %12 : vector<1x1x32xf32> to vector<1x32x32xf32>
    %14 = arith.select %11, %13, %8 : vector<1x32x32xi1>, vector<1x32x32xf32>
    %c0_11 = arith.constant 0 : index
    %c0_12 = arith.constant 0 : index
    %c0_13 = arith.constant 0 : index
    %15 = vector.load %arg6[%c0_11, %c0_12, %c0_13] : memref<1x32x32xf32, #tpu.memory_space<vmem>>, vector<1x32x32xf32>
    tpu.vector_store %arg6[%c0_11, %c0_12, %c0_13], %14 {strides = array<i32>} : memref<1x32x32xf32, #tpu.memory_space<vmem>>, vector<1x32x32xf32>,
    return
  }
  func.func @transform_0(%arg0: i32, %arg1: i32) -> (i32, i32, i32) {
    %c0_i32 = arith.constant 0 : i32
    %c0_i32_0 = arith.constant 0 : i32
    return %arg0, %arg1, %c0_i32 : i32, i32, i32
  }
  func.func @transform_1(%arg0: i32, %arg1: i32) -> (i32, i32, i32) {
    %c0_i32 = arith.constant 0 : i32
    %c0_i32_0 = arith.constant 0 : i32
    %c0_i32_1 = arith.constant 0 : i32
    %c0_i32_2 = arith.constant 0 : i32
    return %c0_i32, %c0_i32_0, %c0_i32_1 : i32, i32, i32
  }
  func.func @transform_2(%arg0: i32, %arg1: i32) -> (i32, i32, i32) {
    %c0_i32 = arith.constant 0 : i32
    %c0_i32_0 = arith.constant 0 : i32
    %c0_i32_1 = arith.constant 0 : i32
    %c0_i32_2 = arith.constant 0 : i32
    return %c0_i32, %c0_i32_0, %c0_i32_1 : i32, i32, i32
  }
  func.func @transform_3(%arg0: i32, %arg1: i32) -> (i32, i32, i32) {
    %c0_i32 = arith.constant 0 : i32
    %c0_i32_0 = arith.constant 0 : i32
    %c0_i32_1 = arith.constant 0 : i32
    %c0_i32_2 = arith.constant 0 : i32
    return %c0_i32, %c0_i32_0, %c0_i32_1 : i32, i32, i32
  }
  func.func @transform_4(%arg0: i32, %arg1: i32) -> (i32, i32, i32) {
    %c0_i32 = arith.constant 0 : i32
    %c0_i32_0 = arith.constant 0 : i32
    return %arg0, %arg1, %c0_i32 : i32, i32, i32
  }
}

</mosaic_0001>

<bundles_post_ra>
// kernel: tpu_custom_call.1
= control target key start
LH: loop header
LB: loop body
LE: loop exit
PB: predicated region body
PF: predicated region fallthrough
CT: control target
= control target key end

     0   :  { %v151_v2 = vmov 0   ;;  %s208_s0 = inlined_call_operand.vmem [shape: f32[1,32,1], index: 0, kind: input, shape index: {}]   ;;  %s209_s1 = inlined_call_operand.vmem [shape: f32[1,1,32], index: 1, kind: input, shape index: {}]   ;;  %s210_s2 = inlined_call_operand.vmem [shape: f32[1,1,32], index: 2, kind: input, shape index: {}]   ;;  %s211_s3 = inlined_call_operand.vmem [shape: f32[1,1,32], index: 3, kind: input, shape index: {}]   ;;  %s212_s4 = inlined_call_operand.hbm [shape: f32[1,32,32], index: 4, kind: output, shape index: {}]  }
   0x1   :  { %v20_v0 = vld [vmem:[%s208_s0 + $0x10] sm:$0xff]  ;;  %v18_v1 = vld [vmem:[%s208_s0] sm:$0xff]  ;;  %128 = vset.pattern.permute.xlu1 %v151_v2  ;;  %127 = vset.pattern.permute.xlu0 %v151_v2 }
   0x2   :  { %39 = vperm.xlu1 %128, %v20_v0   ;;  %29 = vperm.xlu0 %127, %v18_v1  }
   0x3   :  { %9 = vsyncpa [#allocation3], 0  ;;  %v21_v3 = vld [vmem:[%s208_s0 + $0x18] sm:$0xff]  ;;  %v19_v4 = vld [vmem:[%s208_s0 + $0x8] sm:$0xff]  ;;  %vm22_vm0 = vcmp.ne.f32.partialorder %v18_v1, %v18_v1  ;;  %vm24_vm2 = vcmp.ne.f32.partialorder %v20_v0, %v20_v0  ;;  %vm99_vm4 = vcmask 261120  }
   0x4   :  { %vm23_vm1 = vcmp.ne.f32.partialorder %v19_v4, %v19_v4  ;;  %v69_v6 = vsel %vm22_vm0, 1, %v151_v2  ;;  %vm25_vm3 = vcmp.ne.f32.partialorder %v21_v3, %v21_v3  ;;  %v71_v8 = vsel %vm24_vm2, 1, %v151_v2  ;;  %v120_v11 = vld [vmem:[%s209_s1] ss:$0 sm:$0xff]  ;;  %s152_s1 = smov [#allocation2]  }
   0x5   :  { %v70_v5 = vsel %vm23_vm1, 1, %v151_v2  ;;  %v72_v7 = vsel %vm25_vm3, 1, %v151_v2  ;;  %v121_v15 = vld [vmem:[%s210_s2] ss:$0 sm:$0xff]  ;;  %s109_s28 = sshll.u32 %s152_s1, 4  ;;  %s110_s28 = int_to_ptr.vmem [resolvable:$true] %s109_s28 }
   0x6   :  { %44 = vperm.xlu1 %128, %v21_v3   ;;  %34 = vperm.xlu0 %127, %v19_v4   ;;  %v122_v18 = vld [vmem:[%s211_s3] ss:$0 sm:$0xff]  ;;  %s129_s2 = scalar_lea.vmem %s110_s28, 512  ;;  %p134_p1 = scmp.lt.s32.totalorder %s110_s28, %s110_s28 }
   0x7   :  { %p130_p0 = scmp.ne.s32.totalorder %s110_s28, %s129_s2  ;;  %p135_p2 = scmp.lt.s32.totalorder %s129_s2, %s129_s2 }
   0x9   :  { %p136_p3 = por %p135_p2, %p134_p1 }
   0xa   :  { %77 = vperm.xlu1 %128, %v70_v5   ;;  %74 = vperm.xlu0 %127, %v69_v6  }
   0xb   :  { %p137_p4 = pnand %p136_p3, %p130_p0 }
   0xe   :  { %83 = vperm.xlu1 %128, %v72_v7   ;;  %80 = vperm.xlu0 %127, %v71_v8  }
  0x7d   :  { %v40_v9 = vpop.permute.xlu1 %39  ;;  %v30_v10 = vpop.permute.xlu0 %29 }
  0x7e   :  { %v53_v12 = vmul.f32 %v120_v11, %v30_v10  ;;  %v55_v19 = vmul.f32 %v120_v11, %v40_v9 }
  0x80   :  { %v64_v20 = vadd.f32 %v121_v15, %v53_v12  ;;  %v66_v26 = vadd.f32 %v121_v15, %v55_v19 }
  0x81   :  { %v45_v13 = vpop.permute.xlu1 %44  ;;  %v35_v14 = vpop.permute.xlu0 %34 }
  0x82   :  { %v54_v16 = vmul.f32 %v120_v11, %v35_v14  ;;  %v56_v21 = vmul.f32 %v120_v11, %v45_v13 }
  0x84   :  { %v65_v17 = vadd.f32 %v121_v15, %v54_v16  ;;  %v67_v27 = vadd.f32 %v121_v15, %v56_v21 }
  0x85   :  { %v78_v22 = vpop.permute.xlu1 %77  ;;  %v75_v23 = vpop.permute.xlu0 %74 }
  0x86   :  { %vm86_vm5 = vcmp.eq.s32.totalorder %v78_v22, 1  ;;  %vm85_vm6 = vcmp.eq.s32.totalorder %v75_v23, 1 }
  0x87   :  { %v96_v24 = vsel %vm86_vm5, %v122_v18, %v65_v17  ;;  %v95_v25 = vsel %vm85_vm6, %v122_v18, %v64_v20 }
  0x88   :  { %101 = vst.msk [vmem:[#allocation2 + $0x8] sm:$0xff] %vm99_vm4, %v96_v24  ;;  %100 = vst.msk [vmem:[#allocation2] sm:$0xff] %vm99_vm4, %v95_v25 }
  0x89   :  { %v84_v28 = vpop.permute.xlu1 %83  ;;  %v81_v29 = vpop.permute.xlu0 %80 }
  0x8a   :  { %vm88_vm7 = vcmp.eq.s32.totalorder %v84_v28, 1  ;;  %vm87_vm8 = vcmp.eq.s32.totalorder %v81_v29, 1 }
  0x8b   :  { %v98_v30 = vsel %vm88_vm7, %v122_v18, %v67_v27  ;;  %v97_v31 = vsel %vm87_vm8, %v122_v18, %v66_v26 }
  0x8c   :  { %103 = vst.msk [vmem:[#allocation2 + $0x18] sm:$0xff] %vm99_vm4, %v98_v30  ;;  %102 = vst.msk [vmem:[#allocation2 + $0x10] sm:$0xff] %vm99_vm4, %v97_v31 }
  0x8d   :  { %140 = shalt.err (!%p137_p4)
}
  0x8e   :  { %s153_s3 = smov 128   ;;  %s154_s29 = smov 8  }
  0x8f   :  { %115 = dma.vmem_to_hbm [thread:$0]  %s110_s28, 512, %s212_s4, [#allocation3], %s153_s3, %s153_s3, %s154_s29  }
  0x90   :  { %149 = dma.done.wait [#allocation3], 512  }
  0x91   :  { %150 = vsyncadd [#allocation3], 4294966784 }
  0x92   :  { %119 = vsyncpa [#allocation3], 1 }

</bundles_post_ra>
